<compile_context>
chip_gen: v5e
topology: v5e:2x2
jax: 0.10.0
libtpu: 0.0.40
codegen_flags: <defaults>
</compile_context>

<pallas_src>
import jax
import jax.numpy as jnp
from jax.experimental import pallas as pl
from jax.experimental.pallas import tpu as pltpu

_LANES = 128          # vreg lane width
_WIDE = 1024          # preferred lane-dense slab width (8 x 128)
_SUBLANES = 8         # f32 sublane count
_MAX_TILE_ELEMS = 2048 * 128   # 1 MiB of f32 per tile (per buffer)


def _logreg_kernel(w_ref, b_ref, x_ref, o_ref):
    # w_ref / b_ref are (1,) f32 scalars in SMEM; x_ref / o_ref are lane-dense
    # f32 tiles in VMEM.  The Linear(1,1) "matmul" is a scalar multiply-add
    # broadcast over the tile (VPU), followed by sigmoid (EUP).
    w = w_ref[0]
    b = b_ref[0]
    o_ref[...] = jax.nn.sigmoid(x_ref[...] * w + b)


def logistic_regression(x, weight, bias, *, tile_rows=2048, use_pallas=None):
    """x: [N, 1] f32, weight: [1, 1] f32, bias: [1] f32 -> [N, 1] f32."""
    n = x.shape[0]
    w_scalar = weight.reshape(-1)[:1]   # (1,)
    b_scalar = bias.reshape(-1)[:1]     # (1,)

    lane_dense_ok = (n % _LANES == 0)
    if use_pallas is None:
        # Only dispatch to Pallas when the reshape is pad-free AND the batch
        # is big enough to amortize the custom-call launch; otherwise the
        # fused XLA elementwise expression is already at HBM roofline.
        use_pallas = lane_dense_ok and n >= (1 << 20)
    if not use_pallas:
        return jax.nn.sigmoid(x * w_scalar[0] + b_scalar[0])

    if not lane_dense_ok:
        # Forced-Pallas ragged / tiny path: single whole-array block (block
        # shape == full array dims is always legal), no pad, no slice.
        return pl.pallas_call(
            _logreg_kernel,
            out_shape=jax.ShapeDtypeStruct(x.shape, x.dtype),
            in_specs=[
                pl.BlockSpec(memory_space=pltpu.MemorySpace.SMEM),
                pl.BlockSpec(memory_space=pltpu.MemorySpace.SMEM),
                pl.BlockSpec(memory_space=pltpu.MemorySpace.VMEM),
            ],
            out_specs=pl.BlockSpec(memory_space=pltpu.MemorySpace.VMEM),
        )(w_scalar, b_scalar, x)

    # ---- pad-free lane-dense view ----------------------------------------
    # [N, 1] -> [N / W, W]; a contiguous reshape, so no HBM copy.
    width = _WIDE if n % _WIDE == 0 else _LANES
    rows = n // width
    x2d = x.reshape(rows, width)

    if rows <= _SUBLANES:
        # Block shape equal to the full array dims (no (8,128) constraint).
        tile = rows
        grid_rows = 1
    else:
        tile_cap = max(_SUBLANES,
                       (_MAX_TILE_ELEMS // width) // _SUBLANES * _SUBLANES)
        tile = min(tile_rows, rows, tile_cap)
        tile = max(_SUBLANES, (tile // _SUBLANES) * _SUBLANES)
        # Keep >= 2 grid steps so the "parallel" axis can be sharded across
        # v7x's two TensorCores (harmless no-op on v5e/v6e).
        if pl.cdiv(rows, tile) == 1 and rows >= 2 * _SUBLANES:
            half = ((rows // 2) // _SUBLANES) * _SUBLANES
            tile = max(_SUBLANES, min(tile, half))
        grid_rows = pl.cdiv(rows, tile)
        # A partial last block is fine: out-of-bounds stores are masked and
        # the op is elementwise, so no garbage ever reaches valid outputs.

    out2d = pl.pallas_call(
        _logreg_kernel,
        out_shape=jax.ShapeDtypeStruct((rows, width), x.dtype),
        grid=(grid_rows,),
        in_specs=[
            # weight / bias: whole (1,) arrays resident in SMEM.
            pl.BlockSpec(memory_space=pltpu.MemorySpace.SMEM),
            pl.BlockSpec(memory_space=pltpu.MemorySpace.SMEM),
            # x: lane-dense tiles, auto double-buffered across the grid.
            pl.BlockSpec((tile, width), lambda i: (i, 0)),
        ],
        out_specs=pl.BlockSpec((tile, width), lambda i: (i, 0)),
        compiler_params=pltpu.CompilerParams(
            dimension_semantics=("parallel",),
        ),
    )(w_scalar, b_scalar, x2d)

    # Free reshape back to the module's [N, 1] output layout (no slice copy).
    return out2d.reshape(n, 1)


if __name__ == "__main__":
    key = jax.random.PRNGKey(0)
    kx, kw, kb = jax.random.split(key, 3)

    # Deterministic params, matching torch.nn.Linear(1, 1) init scheme:
    # uniform(-1/sqrt(fan_in), 1/sqrt(fan_in)) with fan_in = 1.
    weight = jax.random.uniform(kw, (1, 1), jnp.float32, minval=-1.0, maxval=1.0)
    bias = jax.random.uniform(kb, (1,), jnp.float32, minval=-1.0, maxval=1.0)

    def _check(n, **kwargs):
        x = jax.random.normal(kx, (n, 1), jnp.float32)
        out = jax.block_until_ready(
            logistic_regression(x, weight, bias, **kwargs))
        ref = jax.nn.sigmoid(x @ weight.T + bias)
        assert out.shape == (n, 1), f"shape mismatch for n={n}"
        assert jnp.allclose(out, ref, atol=1e-6), f"value mismatch for n={n}"

    # Ragged tiny batch, forced Pallas -> whole-array single-block path.
    _check(8, use_pallas=True)
    # N % 1024 == 0, rows <= 8 -> single full-array lane-dense block.
    _check(2048, use_pallas=True)
    # N % 1024 == 0, multi-step grid (tile capped so grid_rows >= 2).
    _check(16384, use_pallas=True)
    # N % 1024 == 0 with rows=10 -> partial (masked) last block.
    _check(10240, use_pallas=True)
    # N % 128 == 0 but not 1024 -> 128-wide slab branch, partial last block.
    _check(1152, use_pallas=True)
    # Default dispatch: small N -> fused XLA fallback.
    _check(8)

    print("KERNEL_OK")
</pallas_src>

<mosaic_0001>
module attributes {stable_mosaic.version = 11 : i64} {
  func.func @_logreg_kernel(%arg0: memref<1xf32, #tpu.memory_space<smem>>, %arg1: memref<1xf32, #tpu.memory_space<smem>>, %arg2: memref<8x1xf32, #tpu.memory_space<vmem>>, %arg3: memref<8x1xf32, #tpu.memory_space<vmem>>) attributes {dimension_semantics = [], scalar_prefetch = 0 : i64, scratch_operands = 0 : i64, tpu.core_type = #tpu.core_type<tc>} {
    %c0 = arith.constant 0 : index
    %0 = memref.load %arg0[%c0] : memref<1xf32, #tpu.memory_space<smem>>
    %c0_0 = arith.constant 0 : index
    %1 = memref.load %arg1[%c0_0] : memref<1xf32, #tpu.memory_space<smem>>
    %c0_1 = arith.constant 0 : index
    %c0_2 = arith.constant 0 : index
    %2 = vector.load %arg2[%c0_1, %c0_2] : memref<8x1xf32, #tpu.memory_space<vmem>>, vector<8x1xf32>
    %3 = vector.broadcast %0 : f32 to vector<8x1xf32>
    %4 = arith.mulf %2, %3 : vector<8x1xf32>
    %5 = vector.broadcast %1 : f32 to vector<8x1xf32>
    %6 = arith.addf %4, %5 : vector<8x1xf32>
    %7 = arith.negf %6 : vector<8x1xf32>
    %8 = math.exp %7 : vector<8x1xf32>
    %cst = arith.constant 1.000000e+00 : f32
    %9 = vector.broadcast %cst : f32 to vector<8x1xf32>
    %10 = arith.addf %9, %8 : vector<8x1xf32>
    %11 = arith.divf %9, %10 : vector<8x1xf32>
    %c0_3 = arith.constant 0 : index
    %c0_4 = arith.constant 0 : index
    %12 = vector.load %arg3[%c0_3, %c0_4] : memref<8x1xf32, #tpu.memory_space<vmem>>, vector<8x1xf32>
    tpu.vector_store %arg3[%c0_3, %c0_4], %11 {strides = array<i32>} : memref<8x1xf32, #tpu.memory_space<vmem>>, vector<8x1xf32>,
    return
  }
}

</mosaic_0001>

<bundles_post_ra>
// kernel: tpu_custom_call.1
= control target key start
LH: loop header
LB: loop body
LE: loop exit
PB: predicated region body
PF: predicated region fallthrough
CT: control target
= control target key end

     0   :  { %vm42_vm4 = vcmask 7168   ;;  %s85_s0 = inlined_call_operand.<no memory space> [shape: f32[1], index: 0, kind: input, shape index: {}]   ;;  %s86_s1 = inlined_call_operand.<no memory space> [shape: f32[1], index: 1, kind: input, shape index: {}]   ;;  %s87_s2 = inlined_call_operand.vmem [shape: f32[8,1], index: 2, kind: input, shape index: {}]   ;;  %s88_s3 = inlined_call_operand.vmem [shape: f32[8,1], index: 3, kind: output, shape index: {}]  }
   0x1   :  { %v18_v0 = vld [vmem:[%s87_s2] sm:$0xff]  ;;  %v19_v1 = vstv %s85_s0  ;;  %v21_v2 = vstv %s86_s1 }
   0x2   :  { %v20_v3 = vmul.f32 %v19_v1, %v18_v0 }
   0x4   :  { %v22_v4 = vadd.f32 %v21_v2, %v20_v3 }
   0x6   :  { %v48_v5 = vmul.f32 -1.442695, %v22_v4 }
   0x8   :  { %49 = vpow2.f32 %v48_v5 }
   0xe   :  { %v50_v6 = vpop.eup %49 }
   0xf   :  { %v26_v7 = vadd.f32 1.0, %v50_v6 }
  0x11   :  { %51 = vrcp.f32 %v26_v7  ;;  %v38_v10 = vand.u32 2147483648, %v26_v7  ;;  %vm32_vm0 = vweird.f32 %v26_v7  ;;  %v36_v12 = vand.u32 2147483647, %v26_v7 }
  0x13   :  { %v39_v14 = vor.u32 1.1754944e-38, %v38_v10  ;;  %vm37_vm3 = vcmp.eq.f32.partialorder %v36_v12, 8.507059e+37 }
  0x17   :  { %v52_v8 = vpop.eup %51 }
  0x18   :  { %v28_v9 = vmul.f32 %v52_v8, %v26_v7  ;;  %vm33_vm1 = vweird.f32 %v52_v8 }
  0x19   :  { %vm34_vm2 = vmor %vm32_vm0, %vm33_vm1 }
  0x1a   :  { %v29_v11 = vsub.f32 1.0, %v28_v9 }
  0x1c   :  { %v30_v13 = vmul.f32 %v52_v8, %v29_v11 }
  0x1e   :  { %v31_v15 = vadd.f32 %v52_v8, %v30_v13 }
  0x20   :  { %v35_v16 = vsel %vm34_vm2, %v52_v8, %v31_v15 }
  0x21   :  { %v40_v17 = vsel %vm37_vm3, %v39_v14, %v35_v16 }
  0x22   :  { %43 = vst.msk [vmem:[%s88_s3] sm:$0xff] %vm42_vm4, %v40_v17 }

</bundles_post_ra>
